<compile_context>
chip_gen: v6e
topology: v6e:2x2x1
jax: 0.10.0
libtpu: 0.0.40
codegen_flags: <defaults>
</compile_context>

<pallas_src>
import functools

import jax
import jax.numpy as jnp
from jax import lax
from jax.experimental import pallas as pl
from jax.experimental.pallas import tpu as pltpu

LANE = 128


# ----------------------- Pallas kernels -----------------------

def _conv_gemm_stats_resident_kernel(p_ref, w_ref, y_ref, s_ref):
    """Whole-K, whole-Cout conv GEMM for one row tile + per-channel sum/sumsq.

    Weights are VMEM-resident (constant block index); stats come from the f32
    accumulator value before the bf16 downcast of y.
    """
    y = jnp.dot(p_ref[...], w_ref[...], preferred_element_type=jnp.float32)
    y_ref[...] = y.astype(y_ref.dtype)
    # Two separate row writes (avoids a concatenate / sublane shuffle).
    s_ref[0:1, :] = jnp.sum(y, axis=0, keepdims=True)
    s_ref[1:2, :] = jnp.sum(y * y, axis=0, keepdims=True)


def _conv_gemm_stats_split_kernel(p_ref, w_ref, y_ref, s_ref, acc_ref):
    """K-split fallback: f32 accumulation in scratch, emit bf16 y + stats last."""
    k = pl.program_id(2)

    @pl.when(k == 0)
    def _init():
        acc_ref[...] = jnp.zeros_like(acc_ref)

    acc_ref[...] += jnp.dot(p_ref[...], w_ref[...],
                            preferred_element_type=jnp.float32)

    @pl.when(k == pl.num_programs(2) - 1)
    def _finalize():
        y = acc_ref[...]                                   # f32, pre-downcast
        y_ref[...] = y.astype(y_ref.dtype)
        s_ref[0:1, :] = jnp.sum(y, axis=0, keepdims=True)
        s_ref[1:2, :] = jnp.sum(y * y, axis=0, keepdims=True)


def _bn_act_transpose_kernel(y_ref, ss_ref, o_ref, *, relu):
    """Fused BN affine + optional ReLU + (rows, ch) -> (ch, rows) tile transpose."""
    out = y_ref[...].astype(jnp.float32) * ss_ref[0:1, :] + ss_ref[1:2, :]
    if relu:
        out = jnp.maximum(out, 0.0)
    o_ref[...] = out.T.astype(o_ref.dtype)   # XLU transpose: free slot in a DMA-bound pass


# ----------------------- planning / glue (plain JAX) -----------------------

def _round_up(x, m):
    return ((x + m - 1) // m) * m


def _vmem_budget():
    """Generation-aware VMEM budget (bytes): ~75% of per-core physical VMEM."""
    cap = None
    try:
        info = pltpu.get_tpu_info()
        for name in ("vmem_capacity_bytes", "vmem_bytes", "vmem_size_bytes"):
            cap = getattr(info, name, None)
            if cap:
                break
    except Exception:
        cap = None
    if not cap:
        cap = 64 * 1024 * 1024                 # v7x-safe conservative fallback
    cap = max(32 * 1024 * 1024, min(int(cap), 128 * 1024 * 1024))
    return cap * 3 // 4


def _plan_pass1(n_img, ohw, k_dim, cout, budget):
    cout_pad = _round_up(cout, LANE)
    k_pad = _round_up(k_dim, LANE)
    resident = (k_pad * cout_pad * 2) <= min(budget // 4, 8 * 1024 * 1024)
    if resident:
        tk, tn = k_pad, cout_pad
    else:
        tk = max(t for t in (512, 384, 256, 128) if k_pad % t == 0)
        tn = max(t for t in (512, 384, 256, 128) if cout_pad % t == 0)
    nk, nn = k_pad // tk, cout_pad // tn

    def footprint(tm):
        f = 2 * tm * tk * 2            # patch tiles (bf16, double-buffered)
        f += 2 * tk * tn * 2           # weight tiles (bf16, double-buffered)
        f += 2 * tm * tn * 2           # y tiles (bf16, double-buffered)
        f += 2 * 2 * cout_pad * 4      # partial-stats tiles
        if nk > 1:
            f += tm * tn * 4           # f32 accumulator scratch
        return f

    tm = min(512, _round_up(ohw, LANE))
    while tm > LANE and footprint(tm) > budget * 7 // 10:
        tm -= LANE
    ohw_pad = _round_up(ohw, tm)
    nm = n_img * (ohw_pad // tm)
    if nm * nn < 2 and tm > LANE:      # keep both v7x TensorCores busy
        tm = max(LANE, _round_up(tm // 2, LANE))
        ohw_pad = _round_up(ohw, tm)
        nm = n_img * (ohw_pad // tm)
    return dict(cout_pad=cout_pad, k_pad=k_pad, tm=tm, tn=tn, tk=tk,
                ohw_pad=ohw_pad, nm=nm, nn=nn, nk=nk, resident=resident)


def _plan_pass2(ohw_pad, cout_pad, budget):
    if cout_pad <= 512:
        tn = cout_pad
    else:
        tn = max(t for t in (512, 384, 256, 128) if cout_pad % t == 0)
    cands = [t for t in range(LANE, min(512, ohw_pad) + 1, LANE) if ohw_pad % t == 0]
    tm = max(cands)

    def footprint(t):
        return 2 * t * tn * 2 + 2 * tn * t * 4 + 2 * 2 * cout_pad * 4

    while footprint(tm) > budget * 7 // 10:
        smaller = [t for t in cands if t < tm]
        if not smaller:
            break
        tm = max(smaller)
    return tm, tn


def _im2col(x, kh, kw, stride, padding):
    """x: (N, C, H, W) -> patches (N, OH*OW, C*KH*KW); feature order = (C, KH, KW)."""
    n, c, h, w = x.shape
    xp = jnp.pad(x, ((0, 0), (0, 0), (padding, padding), (padding, padding)))
    oh = (h + 2 * padding - kh) // stride + 1
    ow = (w + 2 * padding - kw) // stride + 1
    cols = []
    for i in range(kh):
        for j in range(kw):
            cols.append(xp[:, :, i:i + oh * stride:stride, j:j + ow * stride:stride])
    patches = jnp.stack(cols, axis=0)              # (KH*KW, N, C, OH, OW)
    patches = patches.transpose(1, 3, 4, 2, 0)     # (N, OH, OW, C, KH*KW)
    return patches.reshape(n, oh * ow, c * kh * kw), oh, ow


@functools.partial(jax.jit,
                   static_argnames=("stride", "padding", "activation", "eps"))
def conv_bn(x, w, b, gamma, beta, *, stride=1, padding=0, activation=None,
            eps=1e-5):
    """ConvBN forward. x: (N, Cin, H, W) -> (N, Cout, OH, OW), float32.

    Training-mode BatchNorm (batch statistics), matching nn.BatchNorm2d in
    train mode. The conv bias `b` cancels exactly ((y+b) - mean(y+b) == y -
    mean(y), variance unchanged), so it never enters the hot loop.
    """
    del b  # analytically cancelled by training-mode BN (see docstring)
    n, cin, h, _w_in = x.shape
    cout, cin2, kh, kw = w.shape
    assert cin == cin2

    budget = _vmem_budget()

    # im2col on bf16 input (halves the KH*KW-inflated patches HBM traffic).
    # TODO(synk): largest remaining win is avoiding the materialized im2col
    # entirely (tap-loop over (kh, kw, Cin) via BlockSpec index arithmetic on a
    # padded NHWC input) — structural follow-up.
    patches, oh, ow = _im2col(x.astype(jnp.bfloat16), kh, kw, stride, padding)
    ohw = oh * ow
    k_dim = cin * kh * kw
    m_true = n * ohw

    p1 = _plan_pass1(n, ohw, k_dim, cout, budget)
    cout_pad, k_pad, ohw_pad = p1["cout_pad"], p1["k_pad"], p1["ohw_pad"]
    tm1, tn1, tk1 = p1["tm"], p1["tn"], p1["tk"]
    nm, nn, nk = p1["nm"], p1["nn"], p1["nk"]
    m_pad = n * ohw_pad

    # Zero padding is exact: padded rows / channels / K columns contribute 0.
    patches = jnp.pad(patches, ((0, 0), (0, ohw_pad - ohw), (0, k_pad - k_dim)))
    patches = patches.reshape(m_pad, k_pad)
    w_mat = w.reshape(cout, k_dim).T.astype(jnp.bfloat16)          # (K, Cout)
    w_mat = jnp.pad(w_mat, ((0, k_pad - k_dim), (0, cout_pad - cout)))

    # --- pass 1: conv GEMM (bf16 in, f32 acc, bf16 out) + partial BN stats ---
    out_shapes = (jax.ShapeDtypeStruct((m_pad, cout_pad), jnp.bfloat16),
                  jax.ShapeDtypeStruct((nm, 2, cout_pad), jnp.float32))
    if p1["resident"]:
        y, part = pl.pallas_call(
            _conv_gemm_stats_resident_kernel,
            out_shape=out_shapes,
            grid=(nm,),
            in_specs=[pl.BlockSpec((tm1, k_pad), lambda i: (i, 0)),
                      pl.BlockSpec((k_pad, cout_pad), lambda i: (0, 0))],
            out_specs=(pl.BlockSpec((tm1, cout_pad), lambda i: (i, 0)),
                       pl.BlockSpec((None, 2, cout_pad), lambda i: (i, 0, 0))),
            compiler_params=pltpu.CompilerParams(
                dimension_semantics=("parallel",),
                vmem_limit_bytes=budget),
        )(patches, w_mat)
    else:
        y, part = pl.pallas_call(
            _conv_gemm_stats_split_kernel,
            out_shape=out_shapes,
            grid=(nm, nn, nk),
            in_specs=[pl.BlockSpec((tm1, tk1), lambda i, j, k: (i, k)),
                      pl.BlockSpec((tk1, tn1), lambda i, j, k: (k, j))],
            out_specs=(pl.BlockSpec((tm1, tn1), lambda i, j, k: (i, j)),
                       pl.BlockSpec((None, 2, tn1), lambda i, j, k: (i, 0, j))),
            scratch_shapes=[pltpu.VMEM((tm1, tn1), jnp.float32)],
            compiler_params=pltpu.CompilerParams(
                dimension_semantics=("parallel", "parallel", "arbitrary"),
                vmem_limit_bytes=budget),
        )(patches, w_mat)

    # --- tiny per-channel BN math (Cout values) in plain JAX -----------------
    # TODO(synk): for extreme M with large per-channel DC offsets, merge
    # per-tile (count, mean, M2) Chan/Welford stats instead of raw sum/sumsq.
    stats = jnp.sum(part, axis=0)                       # (2, cout_pad)
    mean = stats[0] / m_true
    var = jnp.maximum(stats[1] / m_true - mean * mean, 0.0)   # biased variance
    gamma_p = jnp.pad(gamma.astype(jnp.float32), (0, cout_pad - cout))
    beta_p = jnp.pad(beta.astype(jnp.float32), (0, cout_pad - cout))
    scale = gamma_p * lax.rsqrt(var + eps)
    shift = beta_p - mean * scale
    scale_shift = jnp.stack([scale, shift], axis=0)     # (2, cout_pad) f32

    # --- pass 2: fused BN affine + ReLU + (rows,ch)->(ch,rows), NCHW output --
    tm2, tn2 = _plan_pass2(ohw_pad, cout_pad, budget)
    row_steps = ohw_pad // tm2
    out_nchw = pl.pallas_call(
        functools.partial(_bn_act_transpose_kernel,
                          relu=(activation == "relu")),
        out_shape=jax.ShapeDtypeStruct((n, cout_pad, ohw_pad), jnp.float32),
        grid=(n, row_steps, cout_pad // tn2),
        in_specs=[pl.BlockSpec((tm2, tn2),
                               lambda bi, i, j: (bi * row_steps + i, j)),
                  pl.BlockSpec((2, tn2), lambda bi, i, j: (0, j))],
        out_specs=pl.BlockSpec((None, tn2, tm2), lambda bi, i, j: (bi, j, i)),
        compiler_params=pltpu.CompilerParams(
            dimension_semantics=("parallel", "parallel", "parallel"),
            vmem_limit_bytes=budget),
    )(y, scale_shift)

    # Cheap slice + reshape only (the transpose already happened in pass 2).
    return out_nchw[:, :cout, :ohw].reshape(n, cout, oh, ow)


# ----------------------- reference (plain JAX, module semantics) -------------

def conv_bn_ref(x, w, b, gamma, beta, *, stride, padding, activation, eps=1e-5):
    y = lax.conv_general_dilated(
        x.astype(jnp.float32), w.astype(jnp.float32),
        window_strides=(stride, stride),
        padding=[(padding, padding), (padding, padding)],
        dimension_numbers=("NCHW", "OIHW", "NCHW"))
    y = y + b.reshape(1, -1, 1, 1)
    mean = jnp.mean(y, axis=(0, 2, 3), keepdims=True)
    var = jnp.mean((y - mean) ** 2, axis=(0, 2, 3), keepdims=True)
    y = (y - mean) / jnp.sqrt(var + eps)
    y = y * gamma.reshape(1, -1, 1, 1) + beta.reshape(1, -1, 1, 1)
    if activation == "relu":
        y = jnp.maximum(y, 0.0)
    return y


if __name__ == "__main__":
    # ConvBN(in=4, out=8, kernel=3, stride=1, padding=1, activation='relu').
    N, CIN, COUT, H, W, KH, KW = 2, 4, 8, 16, 16, 3, 3
    stride, padding, activation = 1, 1, "relu"

    key = jax.random.PRNGKey(0)
    kx, kw_, kb, kg, kbe = jax.random.split(key, 5)
    x = jax.random.normal(kx, (N, CIN, H, W), dtype=jnp.float32)
    conv_w = 0.1 * jax.random.normal(kw_, (COUT, CIN, KH, KW), dtype=jnp.float32)
    conv_b = 0.1 * jax.random.normal(kb, (COUT,), dtype=jnp.float32)
    gamma = 1.0 + 0.1 * jax.random.normal(kg, (COUT,), dtype=jnp.float32)
    beta = 0.1 * jax.random.normal(kbe, (COUT,), dtype=jnp.float32)

    out = conv_bn(x, conv_w, conv_b, gamma, beta,
                  stride=stride, padding=padding, activation=activation)
    out = jax.block_until_ready(out)
    assert out.shape == (N, COUT, H, W)

    # Check vs. reference on the same bf16-quantized conv operands the MXU sees
    # (f32 accumulation in both). Tolerance covers the bf16 intermediate y.
    x_q = x.astype(jnp.bfloat16).astype(jnp.float32)
    w_q = conv_w.astype(jnp.bfloat16).astype(jnp.float32)
    ref_q = conv_bn_ref(x_q, w_q, conv_b, gamma, beta,
                        stride=stride, padding=padding, activation=activation)
    assert jnp.allclose(out, ref_q, rtol=2e-2, atol=2e-2), \
        f"max abs err vs bf16-operand reference: {jnp.max(jnp.abs(out - ref_q))}"

    # Loose check against exact f32 module semantics (bounds the deliberate
    # bf16 operand + intermediate quantization used for MXU/HBM throughput).
    ref = conv_bn_ref(x, conv_w, conv_b, gamma, beta,
                      stride=stride, padding=padding, activation=activation)
    assert jnp.allclose(out, ref, rtol=6e-2, atol=6e-2), \
        f"max abs err vs f32 reference: {jnp.max(jnp.abs(out - ref))}"

    print("KERNEL_OK")
</pallas_src>

<mosaic_0001>
module attributes {stable_mosaic.version = 11 : i64} {
  func.func @_conv_gemm_stats_resident_kernel(%arg0: i32, %arg1: memref<256x128xbf16, #tpu.memory_space<vmem>>, %arg2: memref<128x128xbf16, #tpu.memory_space<vmem>>, %arg3: memref<256x128xbf16, #tpu.memory_space<vmem>>, %arg4: memref<1x2x128xf32, #tpu.memory_space<vmem>>) attributes {dimension_semantics = [#tpu.dimension_semantics<parallel>], iteration_bounds = array<i64: 2>, scalar_prefetch = 0 : i64, scratch_operands = 0 : i64, tpu.core_type = #tpu.core_type<tc>, window_params = [{transform_indices = @transform_0, window_bounds = array<i64: 256, 128>}, {pipeline_mode = #tpu.pipeline_mode<synchronous>, transform_indices = @transform_1, window_bounds = array<i64: 128, 128>}, {transform_indices = @transform_2, window_bounds = array<i64: 256, 128>}, {transform_indices = @transform_3, window_bounds = array<i64: 1, 2, 128>}]} {
    %c0 = arith.constant 0 : index
    %c0_0 = arith.constant 0 : index
    %0 = vector.load %arg1[%c0, %c0_0] : memref<256x128xbf16, #tpu.memory_space<vmem>>, vector<256x128xbf16>
    %c0_1 = arith.constant 0 : index
    %c0_2 = arith.constant 0 : index
    %1 = vector.load %arg2[%c0_1, %c0_2] : memref<128x128xbf16, #tpu.memory_space<vmem>>, vector<128x128xbf16>
    %cst = arith.constant dense<0.000000e+00> : vector<256x128xf32>
    %2 = tpu.matmul %0, %1, %cst {dimension_numbers = #tpu.dot_dimension_numbers<[1], [0], [0], [1], [0, 0, 1, 1], [], []>} : vector<256x128xbf16>, vector<128x128xbf16>, vector<256x128xf32> -> vector<256x128xf32>
    %3 = arith.truncf %2 : vector<256x128xf32> to vector<256x128xbf16>
    %c0_3 = arith.constant 0 : index
    %c0_4 = arith.constant 0 : index
    %4 = vector.load %arg3[%c0_3, %c0_4] : memref<256x128xbf16, #tpu.memory_space<vmem>>, vector<256x128xbf16>
    tpu.vector_store %arg3[%c0_3, %c0_4], %3 {strides = array<i32>} : memref<256x128xbf16, #tpu.memory_space<vmem>>, vector<256x128xbf16>,
    %cst_5 = arith.constant dense<0.000000e+00> : vector<128xf32>
    %5 = vector.multi_reduction <add>, %2, %cst_5 [0] : vector<256x128xf32> to vector<128xf32>
    %6 = vector.shape_cast %5 : vector<128xf32> to vector<1x128xf32>
    %c0_6 = arith.constant 0 : index
    %c0_7 = arith.constant 0 : index
    %c0_8 = arith.constant 0 : index
    %7 = vector.load %arg4[%c0_6, %c0_7, %c0_8] : memref<1x2x128xf32, #tpu.memory_space<vmem>>, vector<1x1x128xf32>
    %8 = vector.shape_cast %7 : vector<1x1x128xf32> to vector<1x128xf32>
    %9 = vector.shape_cast %6 : vector<1x128xf32> to vector<1x1x128xf32>
    tpu.vector_store %arg4[%c0_6, %c0_7, %c0_8], %9 {strides = array<i32>} : memref<1x2x128xf32, #tpu.memory_space<vmem>>, vector<1x1x128xf32>,
    %10 = arith.mulf %2, %2 : vector<256x128xf32>
    %cst_9 = arith.constant dense<0.000000e+00> : vector<128xf32>
    %11 = vector.multi_reduction <add>, %10, %cst_9 [0] : vector<256x128xf32> to vector<128xf32>
    %12 = vector.shape_cast %11 : vector<128xf32> to vector<1x128xf32>
    %c0_10 = arith.constant 0 : index
    %c1 = arith.constant 1 : index
    %c0_11 = arith.constant 0 : index
    %13 = vector.load %arg4[%c0_10, %c1, %c0_11] : memref<1x2x128xf32, #tpu.memory_space<vmem>>, vector<1x1x128xf32>
    %14 = vector.shape_cast %13 : vector<1x1x128xf32> to vector<1x128xf32>
    %15 = vector.shape_cast %12 : vector<1x128xf32> to vector<1x1x128xf32>
    tpu.vector_store %arg4[%c0_10, %c1, %c0_11], %15 {strides = array<i32>} : memref<1x2x128xf32, #tpu.memory_space<vmem>>, vector<1x1x128xf32>,
    return
  }
  func.func @transform_0(%arg0: i32) -> (i32, i32) {
    %c0_i32 = arith.constant 0 : i32
    %c0_i32_0 = arith.constant 0 : i32
    return %arg0, %c0_i32 : i32, i32
  }
  func.func @transform_1(%arg0: i32) -> (i32, i32) {
    %c0_i32 = arith.constant 0 : i32
    %c0_i32_0 = arith.constant 0 : i32
    %c0_i32_1 = arith.constant 0 : i32
    return %c0_i32, %c0_i32_0 : i32, i32
  }
  func.func @transform_2(%arg0: i32) -> (i32, i32) {
    %c0_i32 = arith.constant 0 : i32
    %c0_i32_0 = arith.constant 0 : i32
    return %arg0, %c0_i32 : i32, i32
  }
  func.func @transform_3(%arg0: i32) -> (i32, i32, i32) {
    %c0_i32 = arith.constant 0 : i32
    %c0_i32_0 = arith.constant 0 : i32
    %c0_i32_1 = arith.constant 0 : i32
    return %arg0, %c0_i32, %c0_i32_0 : i32, i32, i32
  }
}

module attributes {stable_mosaic.version = 11 : i64} {
  func.func @_bn_act_transpose_kernel(%arg0: i32, %arg1: i32, %arg2: i32, %arg3: memref<256x128xbf16, #tpu.memory_space<vmem>>, %arg4: memref<2x128xf32, #tpu.memory_space<vmem>>, %arg5: memref<1x128x256xf32, #tpu.memory_space<vmem>>) attributes {dimension_semantics = [#tpu.dimension_semantics<parallel>, #tpu.dimension_semantics<parallel>, #tpu.dimension_semantics<parallel>], iteration_bounds = array<i64: 2, 1, 1>, scalar_prefetch = 0 : i64, scratch_operands = 0 : i64, tpu.core_type = #tpu.core_type<tc>, window_params = [{transform_indices = @transform_0, window_bounds = array<i64: 256, 128>}, {transform_indices = @transform_1, window_bounds = array<i64: 2, 128>}, {transform_indices = @transform_2, window_bounds = array<i64: 1, 128, 256>}]} {
    %c0 = arith.constant 0 : index
    %c0_0 = arith.constant 0 : index
    %0 = vector.load %arg3[%c0, %c0_0] : memref<256x128xbf16, #tpu.memory_space<vmem>>, vector<256x128xbf16>
    %1 = arith.extf %0 : vector<256x128xbf16> to vector<256x128xf32>
    %c0_1 = arith.constant 0 : index
    %c0_2 = arith.constant 0 : index
    %2 = vector.load %arg4[%c0_1, %c0_2] : memref<2x128xf32, #tpu.memory_space<vmem>>, vector<1x128xf32>
    %3 = vector.broadcast %2 : vector<1x128xf32> to vector<256x128xf32>
    %4 = arith.mulf %1, %3 : vector<256x128xf32>
    %c1 = arith.constant 1 : index
    %c0_3 = arith.constant 0 : index
    %5 = vector.load %arg4[%c1, %c0_3] : memref<2x128xf32, #tpu.memory_space<vmem>>, vector<1x128xf32>
    %6 = vector.broadcast %5 : vector<1x128xf32> to vector<256x128xf32>
    %7 = arith.addf %4, %6 : vector<256x128xf32>
    %cst = arith.constant 0.000000e+00 : f32
    %8 = vector.broadcast %cst : f32 to vector<256x128xf32>
    %9 = arith.maximumf %7, %8 : vector<256x128xf32>
    %10 = tpu.transpose %9, [1, 0] : vector<256x128xf32> -> vector<128x256xf32>
    %c0_4 = arith.constant 0 : index
    %c0_5 = arith.constant 0 : index
    %c0_6 = arith.constant 0 : index
    %11 = vector.load %arg5[%c0_4, %c0_5, %c0_6] : memref<1x128x256xf32, #tpu.memory_space<vmem>>, vector<1x128x256xf32>
    %12 = vector.shape_cast %11 : vector<1x128x256xf32> to vector<128x256xf32>
    %13 = vector.shape_cast %10 : vector<128x256xf32> to vector<1x128x256xf32>
    tpu.vector_store %arg5[%c0_4, %c0_5, %c0_6], %13 {strides = array<i32>} : memref<1x128x256xf32, #tpu.memory_space<vmem>>, vector<1x128x256xf32>,
    return
  }
  func.func @transform_0(%arg0: i32, %arg1: i32, %arg2: i32) -> (i32, i32) {
    %c1_i32 = arith.constant 1 : i32
    %0 = arith.muli %arg0, %c1_i32 : i32
    %1 = arith.addi %0, %arg1 : i32
    %c0_i32 = arith.constant 0 : i32
    return %1, %arg2 : i32, i32
  }
  func.func @transform_1(%arg0: i32, %arg1: i32, %arg2: i32) -> (i32, i32) {
    %c0_i32 = arith.constant 0 : i32
    %c0_i32_0 = arith.constant 0 : i32
    return %c0_i32, %arg2 : i32, i32
  }
  func.func @transform_2(%arg0: i32, %arg1: i32, %arg2: i32) -> (i32, i32, i32) {
    %c0_i32 = arith.constant 0 : i32
    return %arg0, %arg2, %arg1 : i32, i32, i32
  }
}

</mosaic_0001>

<bundles_post_ra>
// kernel: conv_bn.3
= control target key start
LH: loop header
LB: loop body
LE: loop exit
PB: predicated region body
PF: predicated region fallthrough
CT: control target
= control target key end

     0   :  { %s768_s9 = smov 0   ;;  %s770_s10 = smov 0   ;;  %s932_s0 = inlined_call_operand.vmem [shape: bf16[512,128], index: 0, kind: input, shape index: {}]   ;;  %s933_s1 = inlined_call_operand.vmem [shape: f32[2,128], index: 1, kind: input, shape index: {}]   ;;  %s934_s2 = inlined_call_operand.vmem [shape: f32[2,128,256], index: 2, kind: output, shape index: {}]  }
   0x1   :  { %s772_s11 = smov 0  }
   0x2 LB: > { %s31_s12 = sadd.s32 1, %s747_s10  ;;  %p616_p0 = scmp.ge.s32.totalorder %s751_s11, 1  ;;  %s751_s11 = sphi %s772_s11, %s12_s11   ;;  %s747_s10 = sphi %s770_s10, %s936_s10   ;;  %s743_s9 = sphi %s768_s9, %s935_s9  }
   0x3   : > { %p33_p1 = scmp.ge.s32.totalorder %s31_s12, 2  ;;  %p154_p2 = scmp.lt.s32.totalorder %s751_s11, 3 }
   0x5   : > { %s938_s12 = smov (%p33_p1, %s31_s12), 0  ;;  %p155_p3 = pnand %p616_p0, %p154_p2 }
   0x6   : > { %s617_s13 = sshll.u32 (!%p155_p3), %s743_s9, 5  ;;  %p210_p5 = scmp.lt.s32.totalorder (!%p155_p3), %s743_s9, 1 }
   0x7   : > { %158 = sbr.rel (%p155_p3) target bundleno = 211 (0xd3), region = 28  ;;  %p195_p4 = scmp.lt.s32.totalorder (!%p155_p3), %s617_s13, 63 }
   0xc   : > { %s940_s13 = smov (!%p195_p4, %s617_s13), 63  ;;  %v797_v0 = vld [vmem:[%s933_s1] ss:$0 sm:$0xff]  ;;  %v806_v9 = vld [vmem:[%s933_s1 + $0x1] ss:$0 sm:$0xff]  ;;  %s942_s9 = smov (!%p210_p5, %s743_s9), 1 }
   0xd   : > { %s618_s14 = sshll.u32 %s940_s13, 2  ;;  %s625_s22 = sshll.u32 %s942_s9, 8 }
   0xe   : > { %s792_s17 = scalar_lea.vmem %s932_s0, %s618_s14  ;;  %s889_s25 = scalar_lea.vmem %s934_s2, %s625_s22 }
   0xf   : > { %v697_v1 = vld [vmem:[%s792_s17 + $0x40] sm:$0xff]   ;;  %v698_v3 = vld [vmem:[%s792_s17 + $0x48] sm:$0xff]   ;;  %v699_v24 = vld [vmem:[%s792_s17 + $0x50] sm:$0xff]  }
  0x10   : > { %v627_v2 = vld [vmem:[%s792_s17] sm:$0xff]   ;;  %v660_v4 = vunpack.c.l.bf16 %v697_v1  ;;  %v661_v6 = vunpack.c.h.bf16 %v697_v1  ;;  %v690_v8 = vld [vmem:[%s792_s17 + $0x8] sm:$0xff]   ;;  %v664_v10 = vunpack.c.l.bf16 %v698_v3  ;;  %v665_v18 = vunpack.c.h.bf16 %v698_v3  ;;  %v691_v25 = vld [vmem:[%s792_s17 + $0x10] sm:$0xff]  }
  0x11   : > { %v628_v5 = vunpack.c.l.bf16 %v627_v2  ;;  %v629_v7 = vunpack.c.h.bf16 %v627_v2  ;;  %v632_v11 = vunpack.c.l.bf16 %v690_v8  ;;  %v633_v19 = vunpack.c.h.bf16 %v690_v8  ;;  %v700_v44 = vld [vmem:[%s792_s17 + $0x58] sm:$0xff]   ;;  %v701_v62 = vld [vmem:[%s792_s17 + $0x60] sm:$0xff]  }
  0x12   : > { %v309_v12 = vmul.f32 %v660_v4, %v797_v0  ;;  %v310_v14 = vmul.f32 %v661_v6, %v797_v0  ;;  %v311_v16 = vmul.f32 %v664_v10, %v797_v0  ;;  %v312_v30 = vmul.f32 %v665_v18, %v797_v0  ;;  %v692_v45 = vld [vmem:[%s792_s17 + $0x18] sm:$0xff]   ;;  %v693_v63 = vld [vmem:[%s792_s17 + $0x20] sm:$0xff]   ;;  %v702_v18 = vld [vmem:[%s792_s17 + $0x68] sm:$0xff]  }
  0x13   : > { %v293_v13 = vmul.f32 %v628_v5, %v797_v0  ;;  %v294_v15 = vmul.f32 %v629_v7, %v797_v0  ;;  %v295_v17 = vmul.f32 %v632_v11, %v797_v0  ;;  %v296_v31 = vmul.f32 %v633_v19, %v797_v0  ;;  %v694_v19 = vld [vmem:[%s792_s17 + $0x28] sm:$0xff]  }
  0x14   : > { %v346_v20 = vadd.f32 %v806_v9, %v309_v12  ;;  %v347_v22 = vadd.f32 %v806_v9, %v310_v14  ;;  %v348_v28 = vadd.f32 %v806_v9, %v311_v16  ;;  %v668_v34 = vunpack.c.l.bf16 %v699_v24 }
  0x15   : > { %v330_v21 = vadd.f32 %v806_v9, %v293_v13  ;;  %v331_v23 = vadd.f32 %v806_v9, %v294_v15  ;;  %v332_v29 = vadd.f32 %v806_v9, %v295_v17  ;;  %v636_v35 = vunpack.c.l.bf16 %v691_v25 }
  0x16   : > { %v378_v26 = vmax.f32 %v346_v20, 0.0  ;;  %v379_v32 = vmax.f32 %v347_v22, 0.0  ;;  %v380_v36 = vmax.f32 %v348_v28, 0.0  ;;  %v349_v37 = vadd.f32 %v806_v9, %v312_v30 }
  0x17   : > { %v362_v27 = vmax.f32 %v330_v21, 0.0  ;;  %v363_v33 = vmax.f32 %v331_v23, 0.0  ;;  %v333_v38 = vadd.f32 %v806_v9, %v296_v31  ;;  %v669_v39 = vunpack.c.h.bf16 %v699_v24 }
  0x18   : > { %426 = vxpose.xlu1.b32.start [1/16] %v378_v26, 128  ;;  %v364_v40 = vmax.f32 %v332_v29, 0.0  ;;  %v313_v41 = vmul.f32 %v668_v34, %v797_v0  ;;  %v297_v42 = vmul.f32 %v636_v35, %v797_v0  ;;  %v637_v43 = vunpack.c.h.bf16 %v691_v25 }
  0x19   : > { %394 = vxpose.xlu0.b32.start [1/16] %v362_v27, 128  ;;  %v381_v46 = vmax.f32 %v349_v37, 0.0  ;;  %v314_v47 = vmul.f32 %v669_v39, %v797_v0  ;;  %v672_v48 = vunpack.c.l.bf16 %v700_v44  ;;  %v640_v49 = vunpack.c.l.bf16 %v692_v45  ;;  %v695_v37 = vld [vmem:[%s792_s17 + $0x30] sm:$0xff]  }
  0x1a   : > { %v365_v50 = vmax.f32 %v333_v38, 0.0  ;;  %v350_v51 = vadd.f32 %v806_v9, %v313_v41  ;;  %v334_v52 = vadd.f32 %v806_v9, %v297_v42  ;;  %v298_v53 = vmul.f32 %v637_v43, %v797_v0 }
  0x1b   : > { %v315_v54 = vmul.f32 %v672_v48, %v797_v0  ;;  %v299_v55 = vmul.f32 %v640_v49, %v797_v0  ;;  %v673_v56 = vunpack.c.h.bf16 %v700_v44  ;;  %v641_v57 = vunpack.c.h.bf16 %v692_v45 }
  0x1c   : > { %427 = vxpose.xlu1.b32.cont [2/16] %v379_v32, 128  ;;  %v382_v58 = vmax.f32 %v350_v51, 0.0  ;;  %v366_v59 = vmax.f32 %v334_v52, 0.0  ;;  %v351_v60 = vadd.f32 %v806_v9, %v314_v47  ;;  %v335_v61 = vadd.f32 %v806_v9, %v298_v53 }
  0x1d   : > { %395 = vxpose.xlu0.b32.cont [2/16] %v363_v33, 128  ;;  %v352_v1 = vadd.f32 %v806_v9, %v315_v54  ;;  %v316_v2 = vmul.f32 %v673_v56, %v797_v0  ;;  %v300_v3 = vmul.f32 %v641_v57, %v797_v0  ;;  %v676_v4 = vunpack.c.l.bf16 %v701_v62  ;;  %v704_v54 = vld [vmem:[%s792_s17 + $0x78] sm:$0xff]  }
  0x1e   : > { %v383_v5 = vmax.f32 %v351_v60, 0.0  ;;  %v367_v6 = vmax.f32 %v335_v61, 0.0  ;;  %v336_v7 = vadd.f32 %v806_v9, %v299_v55  ;;  %v644_v8 = vunpack.c.l.bf16 %v693_v63  ;;  %v696_v55 = vld [vmem:[%s792_s17 + $0x38] sm:$0xff]  }
  0x1f   : > { %v384_v10 = vmax.f32 %v352_v1, 0.0  ;;  %v353_v11 = vadd.f32 %v806_v9, %v316_v2  ;;  %v337_v12 = vadd.f32 %v806_v9, %v300_v3  ;;  %v317_v13 = vmul.f32 %v676_v4, %v797_v0 }
  0x20   : > { %428 = vxpose.xlu1.b32.cont [3/16] %v380_v36, 128  ;;  %v368_v14 = vmax.f32 %v336_v7, 0.0  ;;  %v301_v15 = vmul.f32 %v644_v8, %v797_v0  ;;  %v677_v16 = vunpack.c.h.bf16 %v701_v62  ;;  %v645_v17 = vunpack.c.h.bf16 %v693_v63  ;;  %v703_v36 = vld [vmem:[%s792_s17 + $0x70] sm:$0xff]  }
  0x21   : > { %396 = vxpose.xlu0.b32.cont [3/16] %v364_v40, 128  ;;  %v385_v20 = vmax.f32 %v353_v11, 0.0  ;;  %v354_v21 = vadd.f32 %v806_v9, %v317_v13  ;;  %v680_v22 = vunpack.c.l.bf16 %v702_v18  ;;  %v648_v23 = vunpack.c.l.bf16 %v694_v19 }
  0x22   : > { %v369_v24 = vmax.f32 %v337_v12, 0.0  ;;  %v338_v25 = vadd.f32 %v806_v9, %v301_v15  ;;  %v318_v26 = vmul.f32 %v677_v16, %v797_v0  ;;  %v302_v27 = vmul.f32 %v645_v17, %v797_v0 }
  0x23   : > { %v319_v28 = vmul.f32 %v680_v22, %v797_v0  ;;  %v303_v29 = vmul.f32 %v648_v23, %v797_v0  ;;  %v681_v30 = vunpack.c.h.bf16 %v702_v18  ;;  %v649_v31 = vunpack.c.h.bf16 %v694_v19 }
  0x24   : > { %429 = vxpose.xlu1.b32.cont [4/16] %v381_v46, 128  ;;  %v386_v32 = vmax.f32 %v354_v21, 0.0  ;;  %v370_v33 = vmax.f32 %v338_v25, 0.0  ;;  %v355_v34 = vadd.f32 %v806_v9, %v318_v26  ;;  %v339_v35 = vadd.f32 %v806_v9, %v302_v27 }
  0x25   : > { %397 = vxpose.xlu0.b32.cont [4/16] %v365_v50, 128  ;;  %v356_v38 = vadd.f32 %v806_v9, %v319_v28  ;;  %v320_v39 = vmul.f32 %v681_v30, %v797_v0  ;;  %v304_v40 = vmul.f32 %v649_v31, %v797_v0  ;;  %v684_v41 = vunpack.c.l.bf16 %v703_v36 }
  0x26   : > { %v387_v42 = vmax.f32 %v355_v34, 0.0  ;;  %v371_v43 = vmax.f32 %v339_v35, 0.0  ;;  %v340_v44 = vadd.f32 %v806_v9, %v303_v29  ;;  %v652_v45 = vunpack.c.l.bf16 %v695_v37 }
  0x27   : > { %v388_v46 = vmax.f32 %v356_v38, 0.0  ;;  %v357_v47 = vadd.f32 %v806_v9, %v320_v39  ;;  %v341_v48 = vadd.f32 %v806_v9, %v304_v40  ;;  %v321_v49 = vmul.f32 %v684_v41, %v797_v0 }
  0x28   : > { %430 = vxpose.xlu1.b32.cont [5/16] %v382_v58, 128  ;;  %v372_v50 = vmax.f32 %v340_v44, 0.0  ;;  %v305_v51 = vmul.f32 %v652_v45, %v797_v0  ;;  %v685_v52 = vunpack.c.h.bf16 %v703_v36  ;;  %v653_v53 = vunpack.c.h.bf16 %v695_v37 }
  0x29   : > { %398 = vxpose.xlu0.b32.cont [5/16] %v366_v59, 128  ;;  %v389_v56 = vmax.f32 %v357_v47, 0.0  ;;  %v358_v57 = vadd.f32 %v806_v9, %v321_v49  ;;  %v688_v58 = vunpack.c.l.bf16 %v704_v54  ;;  %v656_v59 = vunpack.c.l.bf16 %v696_v55 }
  0x2a   : > { %v373_v60 = vmax.f32 %v341_v48, 0.0  ;;  %v342_v61 = vadd.f32 %v806_v9, %v305_v51  ;;  %v322_v62 = vmul.f32 %v685_v52, %v797_v0  ;;  %v306_v63 = vmul.f32 %v653_v53, %v797_v0 }
  0x2b   : > { %v323_v1 = vmul.f32 %v688_v58, %v797_v0  ;;  %v307_v2 = vmul.f32 %v656_v59, %v797_v0  ;;  %v689_v3 = vunpack.c.h.bf16 %v704_v54  ;;  %v657_v4 = vunpack.c.h.bf16 %v696_v55 }
  0x2c   : > { %431 = vxpose.xlu1.b32.cont [6/16] %v383_v5, 128  ;;  %v390_v5 = vmax.f32 %v358_v57, 0.0  ;;  %v359_v7 = vadd.f32 %v806_v9, %v322_v62  ;;  %v343_v8 = vadd.f32 %v806_v9, %v306_v63 }
  0x2d   : > { %399 = vxpose.xlu0.b32.cont [6/16] %v367_v6, 128  ;;  %v374_v6 = vmax.f32 %v342_v61, 0.0  ;;  %v308_v11 = vmul.f32 %v657_v4, %v797_v0  ;;  %v344_v15 = vadd.f32 %v806_v9, %v307_v2 }
  0x2e   : > { %v391_v12 = vmax.f32 %v359_v7, 0.0  ;;  %v375_v13 = vmax.f32 %v343_v8, 0.0 }
  0x2f   : > { %v376_v17 = vmax.f32 %v344_v15, 0.0  ;;  %v345_v19 = vadd.f32 %v806_v9, %v308_v11 }
  0x30   : > { %432 = vxpose.xlu1.b32.cont [7/16] %v384_v10, 128  ;;  %v324_v10 = vmul.f32 %v689_v3, %v797_v0 }
  0x31   : > { %400 = vxpose.xlu0.b32.cont [7/16] %v368_v14, 128  ;;  %v360_v14 = vadd.f32 %v806_v9, %v323_v1 }
  0x32   : > { %v361_v18 = vadd.f32 %v806_v9, %v324_v10 }
  0x33   : > { %v392_v16 = vmax.f32 %v360_v14, 0.0 }
  0x34   : > { %433 = vxpose.xlu1.b32.cont [8/16] %v385_v20, 128  ;;  %v393_v0 = vmax.f32 %v361_v18, 0.0  ;;  %v377_v20 = vmax.f32 %v345_v19, 0.0 }
  0x35   : > { %401 = vxpose.xlu0.b32.cont [8/16] %v369_v24, 128 }
  0x38   : > { %434 = vxpose.xlu1.b32.cont [9/16] %v386_v32, 128 }
  0x39   : > { %402 = vxpose.xlu0.b32.cont [9/16] %v370_v33, 128 }
  0x3c   : > { %435 = vxpose.xlu1.b32.cont [10/16] %v387_v42, 128 }
  0x3d   : > { %403 = vxpose.xlu0.b32.cont [10/16] %v371_v43, 128 }
  0x40   : > { %436 = vxpose.xlu1.b32.cont [11/16] %v388_v46, 128 }
  0x41   : > { %404 = vxpose.xlu0.b32.cont [11/16] %v372_v50, 128 }
  0x44   : > { %437 = vxpose.xlu1.b32.cont [12/16] %v389_v56, 128 }
  0x45   : > { %405 = vxpose.xlu0.b32.cont [12/16] %v373_v60, 128 }
  0x48   : > { %438 = vxpose.xlu1.b32.cont [13/16] %v390_v5, 128 }
  0x49   : > { %406 = vxpose.xlu0.b32.cont [13/16] %v374_v6, 128 }
  0x4c   : > { %439 = vxpose.xlu1.b32.cont [14/16] %v391_v12, 128 }
  0x4d   : > { %407 = vxpose.xlu0.b32.cont [14/16] %v375_v13, 128 }
  0x50   : > { %440 = vxpose.xlu1.b32.cont [15/16] %v392_v16, 128 }
  0x51   : > { %408 = vxpose.xlu0.b32.cont [15/16] %v376_v17, 128 }
  0x54   : > { %441 = vxpose.xlu1.b32.end [16/16] %v393_v0, 128 }
  0x55   : > { %409 = vxpose.xlu0.b32.end [16/16] %v377_v20, 128 }
  0x94   : > { %v442_v9 = vpop.trf.xlu1 }
  0x95   : > { %v410_v21 = vpop.trf.xlu0  ;;  %459 = vst [vmem:[%s889_s25 + $0x8] sm:$0xff] %v442_v9 }
  0x96   : > { %458 = vst [vmem:[%s889_s25] sm:$0xff] %v410_v21 }
  0x98   : > { %v443_v22 = vpop.trf.xlu1 }
  0x99   : > { %v411_v23 = vpop.trf.xlu0  ;;  %461 = vst [vmem:[%s889_s25 + $0x18] sm:$0xff] %v443_v22 }
  0x9a   : > { %460 = vst [vmem:[%s889_s25 + $0x10] sm:$0xff] %v411_v23 }
  0x9c   : > { %v444_v24 = vpop.trf.xlu1 }
  0x9d   : > { %v412_v25 = vpop.trf.xlu0  ;;  %463 = vst [vmem:[%s889_s25 + $0x28] sm:$0xff] %v444_v24 }
  0x9e   : > { %462 = vst [vmem:[%s889_s25 + $0x20] sm:$0xff] %v412_v25 }
  0xa0   : > { %v445_v26 = vpop.trf.xlu1 }
  0xa1   : > { %v413_v27 = vpop.trf.xlu0  ;;  %465 = vst [vmem:[%s889_s25 + $0x38] sm:$0xff] %v445_v26 }
  0xa2   : > { %464 = vst [vmem:[%s889_s25 + $0x30] sm:$0xff] %v413_v27 }
  0xa4   : > { %v446_v28 = vpop.trf.xlu1 }
  0xa5   : > { %v414_v29 = vpop.trf.xlu0  ;;  %467 = vst [vmem:[%s889_s25 + $0x48] sm:$0xff] %v446_v28 }
  0xa6   : > { %466 = vst [vmem:[%s889_s25 + $0x40] sm:$0xff] %v414_v29 }
  0xa8   : > { %v447_v30 = vpop.trf.xlu1 }
  0xa9   : > { %v415_v31 = vpop.trf.xlu0  ;;  %469 = vst [vmem:[%s889_s25 + $0x58] sm:$0xff] %v447_v30 }
  0xaa   : > { %468 = vst [vmem:[%s889_s25 + $0x50] sm:$0xff] %v415_v31 }
  0xac   : > { %v448_v32 = vpop.trf.xlu1 }
  0xad   : > { %v416_v33 = vpop.trf.xlu0  ;;  %471 = vst [vmem:[%s889_s25 + $0x68] sm:$0xff] %v448_v32 }
  0xae   : > { %470 = vst [vmem:[%s889_s25 + $0x60] sm:$0xff] %v416_v33 }
  0xb0   : > { %v449_v34 = vpop.trf.xlu1 }
  0xb1   : > { %v417_v35 = vpop.trf.xlu0  ;;  %473 = vst [vmem:[%s889_s25 + $0x78] sm:$0xff] %v449_v34 }
  0xb2   : > { %472 = vst [vmem:[%s889_s25 + $0x70] sm:$0xff] %v417_v35 }
  0xb4   : > { %v450_v36 = vpop.trf.xlu1 }
  0xb5   : > { %v418_v37 = vpop.trf.xlu0  ;;  %475 = vst [vmem:[%s889_s25 + $0x88] sm:$0xff] %v450_v36 }
  0xb6   : > { %474 = vst [vmem:[%s889_s25 + $0x80] sm:$0xff] %v418_v37 }
  0xb8   : > { %v451_v38 = vpop.trf.xlu1 }
  0xb9   : > { %v419_v39 = vpop.trf.xlu0  ;;  %477 = vst [vmem:[%s889_s25 + $0x98] sm:$0xff] %v451_v38 }
  0xba   : > { %476 = vst [vmem:[%s889_s25 + $0x90] sm:$0xff] %v419_v39 }
  0xbc   : > { %v452_v40 = vpop.trf.xlu1 }
  0xbd   : > { %v420_v41 = vpop.trf.xlu0  ;;  %479 = vst [vmem:[%s889_s25 + $0xa8] sm:$0xff] %v452_v40 }
  0xbe   : > { %478 = vst [vmem:[%s889_s25 + $0xa0] sm:$0xff] %v420_v41 }
  0xc0   : > { %v453_v42 = vpop.trf.xlu1 }
  0xc1   : > { %v421_v43 = vpop.trf.xlu0  ;;  %481 = vst [vmem:[%s889_s25 + $0xb8] sm:$0xff] %v453_v42 }
  0xc2   : > { %480 = vst [vmem:[%s889_s25 + $0xb0] sm:$0xff] %v421_v43 }
  0xc4   : > { %v454_v44 = vpop.trf.xlu1 }
  0xc5   : > { %v422_v45 = vpop.trf.xlu0  ;;  %483 = vst [vmem:[%s889_s25 + $0xc8] sm:$0xff] %v454_v44 }
  0xc6   : > { %482 = vst [vmem:[%s889_s25 + $0xc0] sm:$0xff] %v422_v45 }
  0xc8   : > { %v455_v46 = vpop.trf.xlu1 }
  0xc9   : > { %v423_v47 = vpop.trf.xlu0  ;;  %485 = vst [vmem:[%s889_s25 + $0xd8] sm:$0xff] %v455_v46 }
  0xca   : > { %484 = vst [vmem:[%s889_s25 + $0xd0] sm:$0xff] %v423_v47 }
  0xcc   : > { %v456_v48 = vpop.trf.xlu1 }
  0xcd   : > { %v424_v49 = vpop.trf.xlu0  ;;  %487 = vst [vmem:[%s889_s25 + $0xe8] sm:$0xff] %v456_v48 }
  0xce   : > { %486 = vst [vmem:[%s889_s25 + $0xe0] sm:$0xff] %v424_v49 }
  0xd0   : > { %v457_v50 = vpop.trf.xlu1 }
  0xd1   : > { %v425_v51 = vpop.trf.xlu0  ;;  %489 = vst [vmem:[%s889_s25 + $0xf8] sm:$0xff] %v457_v50 }
  0xd2   : > { %488 = vst [vmem:[%s889_s25 + $0xf0] sm:$0xff] %v425_v51 }
  0xd3 PF: > { %s12_s11 = sadd.s32 1, %s751_s11   ;;  %s935_s9 = smov %s747_s10 }
  0xd4   : > { %p9_p6 = scmp.ge.s32.totalorder %s12_s11, 4   ;;  %s936_s10 = smov %s938_s12 }
  0xd6   :  { %11 = sbr.rel (!%p9_p6) target bundleno = 2 (0x2), region = 61 }

// kernel: conv_bn.2
= control target key start
LH: loop header
LB: loop body
LE: loop exit
PB: predicated region body
PF: predicated region fallthrough
CT: control target
= control target key end

     0   :  { %s1237_s12 = smov 0   ;;  %s1419_s0 = inlined_call_operand.vmem [shape: bf16[512,128], index: 0, kind: input, shape index: {}]   ;;  %s1420_s1 = inlined_call_operand.vmem [shape: bf16[128,128], index: 1, kind: input, shape index: {}]   ;;  %s1421_s2 = inlined_call_operand.vmem [shape: bf16[512,128], index: 2, kind: output, shape index: {0}]   ;;  %s1422_s3 = inlined_call_operand.vmem [shape: f32[2,2,128], index: 3, kind: output, shape index: {1}]  }
   0x1 LB: > { %s1243_s13 = sadd.s32 4294967295, %s1215_s12   ;;  %p898_p0 = scmp.ge.s32.totalorder %s1215_s12, 1  ;;  %s1215_s12 = sphi %s1237_s12, %s14_s12  }
   0x2   : > { %p141_p1 = scmp.lt.s32.totalorder %s1215_s12, 3 }
   0x4   : > { %p142_p2 = pnand %p898_p0, %p141_p1 }
   0x5   : > { %s899_s16 = sshll.u32 (!%p142_p2), %s1243_s13, 5  ;;  %p181_p4 = scmp.lt.s32.totalorder (!%p142_p2), %s1243_s13, 1 }
   0x6   : > { %145 = sbr.rel (%p142_p2) target bundleno = 320 (0x140), region = 28  ;;  %p170_p3 = scmp.lt.s32.totalorder (!%p142_p2), %s899_s16, 63 }
   0xb   : > { %v1185_v0 = vld [vmem:[%s1420_s1 + $0x38] sm:$0xff]   ;;  %v1186_v1 = vld [vmem:[%s1420_s1 + $0x30] sm:$0xff]   ;;  %s1424_s16 = smov (!%p170_p3, %s899_s16), 63  ;;  %v1187_v2 = vld [vmem:[%s1420_s1 + $0x28] sm:$0xff]   ;;  %s1426_s13 = smov (!%p181_p4, %s1243_s13), 1 }
   0xc   : > { %1113 = vmatprep.subr.bf16.mxu0 %v1185_v0  ;;  %1161 = vmatprep.subr.bf16.mxu1 %v1185_v0  ;;  %s900_s21 = sshll.u32 %s1424_s16, 2  ;;  %v1188_v3 = vld [vmem:[%s1420_s1 + $0x20] sm:$0xff]   ;;  %v1189_v5 = vld [vmem:[%s1420_s1 + $0x18] sm:$0xff]   ;;  %v1190_v6 = vld [vmem:[%s1420_s1 + $0x10] sm:$0xff]   ;;  %s903_s11 = sshll.u32 %s1426_s13, 1 }
   0xd   : > { %1114 = vmatpush3.bf16.msra.mxu0 %v1185_v0  ;;  %1169 = vmatpush3.bf16.msra.mxu1 %v1185_v0  ;;  %s1265_s24 = scalar_lea.vmem %s1419_s0, %s900_s21  ;;  %v1191_v8 = vld [vmem:[%s1420_s1 + $0x8] sm:$0xff]   ;;  %v1192_v9 = vld [vmem:[%s1420_s1] sm:$0xff]   ;;  %s1307_s10 = scalar_lea.vmem %s1421_s2, %s900_s21 }
   0xe   : > { %1115 = vmatprep.subr.bf16.mxu0 %v1186_v1  ;;  %1162 = vmatprep.subr.bf16.mxu1 %v1186_v1  ;;  %v1193_v4 = vld [vmem:[%s1265_s24] sm:$0xff]   ;;  %v1194_v10 = vld [vmem:[%s1265_s24 + $0x8] sm:$0xff]   ;;  %v1195_v12 = vld [vmem:[%s1265_s24 + $0x10] sm:$0xff]   ;;  %s184_s16 = scalar_lea.vmem %s1422_s3, %s903_s11 }
   0xf   : > { %1129 = vmatprep.mubr.bf16.mxu0 %v1193_v4  ;;  %v1201_v7 = vld [vmem:[%s1265_s24 + $0x40] sm:$0xff]   ;;  %v1202_v11 = vld [vmem:[%s1265_s24 + $0x48] sm:$0xff]   ;;  %v1203_v13 = vld [vmem:[%s1265_s24 + $0x50] sm:$0xff]  }
  0x10   : > { %1145 = vmatprep.mubr.bf16.mxu1 %v1201_v7  ;;  %v1196_v14 = vld [vmem:[%s1265_s24 + $0x18] sm:$0xff]   ;;  %v1197_v16 = vld [vmem:[%s1265_s24 + $0x20] sm:$0xff]   ;;  %v1198_v18 = vld [vmem:[%s1265_s24 + $0x28] sm:$0xff]  }
  0x11   : > { %1116 = vmatpush3.bf16.msra.mxu0 %v1186_v1  ;;  %1170 = vmatpush3.bf16.msra.mxu1 %v1186_v1  ;;  %v1204_v15 = vld [vmem:[%s1265_s24 + $0x58] sm:$0xff]   ;;  %v1205_v17 = vld [vmem:[%s1265_s24 + $0x60] sm:$0xff]   ;;  %v1206_v19 = vld [vmem:[%s1265_s24 + $0x68] sm:$0xff]  }
  0x12   : > { %1117 = vmatprep.subr.bf16.mxu0 %v1187_v2  ;;  %1163 = vmatprep.subr.bf16.mxu1 %v1187_v2  ;;  %v1199_v20 = vld [vmem:[%s1265_s24 + $0x30] sm:$0xff]   ;;  %v1200_v22 = vld [vmem:[%s1265_s24 + $0x38] sm:$0xff]  }
  0x13   : > { %v1207_v21 = vld [vmem:[%s1265_s24 + $0x70] sm:$0xff]   ;;  %v1208_v23 = vld [vmem:[%s1265_s24 + $0x78] sm:$0xff]  }
  0x15   : > { %1118 = vmatpush3.bf16.msra.mxu0 %v1187_v2  ;;  %1171 = vmatpush3.bf16.msra.mxu1 %v1187_v2 }
  0x16   : > { %1119 = vmatprep.subr.bf16.mxu0 %v1188_v3  ;;  %1164 = vmatprep.subr.bf16.mxu1 %v1188_v3 }
  0x19   : > { %1120 = vmatpush3.bf16.msra.mxu0 %v1188_v3  ;;  %1172 = vmatpush3.bf16.msra.mxu1 %v1188_v3 }
  0x1a   : > { %1121 = vmatprep.subr.bf16.mxu0 %v1189_v5  ;;  %1165 = vmatprep.subr.bf16.mxu1 %v1189_v5 }
  0x1d   : > { %1122 = vmatpush3.bf16.msra.mxu0 %v1189_v5  ;;  %1173 = vmatpush3.bf16.msra.mxu1 %v1189_v5 }
  0x1e   : > { %1123 = vmatprep.subr.bf16.mxu0 %v1190_v6  ;;  %1166 = vmatprep.subr.bf16.mxu1 %v1190_v6 }
  0x21   : > { %1124 = vmatpush3.bf16.msra.mxu0 %v1190_v6  ;;  %1174 = vmatpush3.bf16.msra.mxu1 %v1190_v6 }
  0x22   : > { %1125 = vmatprep.subr.bf16.mxu0 %v1191_v8  ;;  %1167 = vmatprep.subr.bf16.mxu1 %v1191_v8 }
  0x25   : > { %1126 = vmatpush3.bf16.msra.mxu0 %v1191_v8  ;;  %1175 = vmatpush3.bf16.msra.mxu1 %v1191_v8 }
  0x26   : > { %1127 = vmatprep.subr.bf16.mxu0 %v1192_v9  ;;  %1168 = vmatprep.subr.bf16.mxu1 %v1192_v9 }
  0x29   : > { %1128 = vmatpush3.bf16.msra.mxu0 %v1192_v9  ;;  %1176 = vmatpush3.bf16.msra.mxu1 %v1192_v9 }
  0x2c   : > { %1130 = vmatmul.mubr.bf16.vlgmr.msra.gmra.mxu0 %v1194_v10  ;;  %1146 = vmatmul.mubr.bf16.vlgmr.msra.gmra.mxu1 %v1202_v11 }
  0x2d   : > { %1133 = vmatprep.mubr.bf16.mxu0 %v1195_v12  ;;  %1149 = vmatprep.mubr.bf16.mxu1 %v1203_v13 }
  0x34   : > { %1134 = vmatmul.mubr.bf16.gmra.mxu0 %v1196_v14  ;;  %1150 = vmatmul.mubr.bf16.gmra.mxu1 %v1204_v15 }
  0x35   : > { %1137 = vmatprep.mubr.bf16.mxu0 %v1197_v16  ;;  %1153 = vmatprep.mubr.bf16.mxu1 %v1205_v17 }
  0x3c   : > { %1138 = vmatmul.mubr.bf16.gmra.mxu0 %v1198_v18  ;;  %1154 = vmatmul.mubr.bf16.gmra.mxu1 %v1206_v19 }
  0x3d   : > { %1141 = vmatprep.mubr.bf16.mxu0 %v1199_v20  ;;  %1157 = vmatprep.mubr.bf16.mxu1 %v1207_v21 }
  0x44   : > { %1142 = vmatmul.mubr.bf16.gmra.mxu0 %v1200_v22  ;;  %1158 = vmatmul.mubr.bf16.gmra.mxu1 %v1208_v23 }
  0xec   : > { %v1131_v24 = vpop.f32.mrf.mxu0  ;;  %v1298_v25 = vpop.f32.mrf.mxu1 }
  0xed   : > { %v739_v41 = vmul.f32 %v1131_v24, %v1131_v24 }
  0xee   : > { %v412_v26 = vpop.f32.mrf.mxu0  ;;  %v1300_v27 = vpop.f32.mrf.mxu1 }
  0xef   : > { %v737_v32 = vmul.f32 %v412_v26, %v412_v26 }
  0xf0   : > { %v1132_v28 = vpop.f32.mrf.mxu0  ;;  %v1309_v29 = vpop.f32.mrf.mxu1 }
  0xf1   : > { %v1002_v30 = vpack.c.bf16 %v1132_v28, %v1131_v24  ;;  %v1042_v31 = vpack.c.bf16 %v1309_v29, %v1298_v25  ;;  %v740_v46 = vmul.f32 %v1132_v28, %v1132_v28 }
  0xf2   : > { %v415_v33 = vpop.f32.mrf.mxu0  ;;  %v1313_v34 = vpop.f32.mrf.mxu1 }
  0xf3   : > { %1074 = vst [vmem:[%s1307_s10 + $0x8] sm:$0xff] %v1002_v30   ;;  %v997_v35 = vpack.c.bf16 %v415_v33, %v412_v26  ;;  %v699_v36 = vadd.f32 %v415_v33, %v412_v26  ;;  %v738_v37 = vmul.f32 %v415_v33, %v415_v33  ;;  %1082 = vst [vmem:[%s1307_s10 + $0x48] sm:$0xff] %v1042_v31  }
  0xf4   : > { %v1037_v38 = vpack.c.bf16 %v1313_v34, %v1300_v27  ;;  %v1135_v39 = vpop.f32.mrf.mxu0  ;;  %v1319_v40 = vpop.f32.mrf.mxu1 }
  0xf5   : > { %998 = vst [vmem:[%s1307_s10] sm:$0xff] %v997_v35   ;;  %v700_v42 = vadd.f32 %v1131_v24, %v699_v36  ;;  %v769_v43 = vadd.f32 %v738_v37, %v737_v32  ;;  %v743_v1 = vmul.f32 %v1135_v39, %v1135_v39 }
  0xf6   : > { %1081 = vst [vmem:[%s1307_s10 + $0x40] sm:$0xff] %v1037_v38   ;;  %v428_v44 = vpop.f32.mrf.mxu0  ;;  %v1323_v45 = vpop.f32.mrf.mxu1 }
  0xf7   : > { %v770_v47 = vadd.f32 %v769_v43, %v739_v41  ;;  %v701_v48 = vadd.f32 %v1132_v28, %v700_v42  ;;  %v741_v52 = vmul.f32 %v428_v44, %v428_v44 }
  0xf8   : > { %v1136_v49 = vpop.f32.mrf.mxu0  ;;  %v1325_v50 = vpop.f32.mrf.mxu1 }
  0xf9   : > { %v702_v51 = vadd.f32 %v701_v48, %v428_v44  ;;  %v771_v53 = vadd.f32 %v770_v47, %v740_v46  ;;  %v1012_v54 = vpack.c.bf16 %v1136_v49, %v1135_v39  ;;  %v1052_v56 = vpack.c.bf16 %v1325_v50, %v1319_v40 }
  0xfa   : > { %v431_v55 = vpop.f32.mrf.mxu0  ;;  %v1329_v57 = vpop.f32.mrf.mxu1  ;;  %v744_v6 = vmul.f32 %v1136_v49, %v1136_v49 }
  0xfb   : > { %v772_v58 = vadd.f32 %v771_v53, %v741_v52  ;;  %1076 = vst [vmem:[%s1307_s10 + $0x18] sm:$0xff] %v1012_v54   ;;  %v1007_v59 = vpack.c.bf16 %v431_v55, %v428_v44  ;;  %v703_v60 = vadd.f32 %v702_v51, %v431_v55  ;;  %v742_v61 = vmul.f32 %v431_v55, %v431_v55 }
  0xfc   : > { %v1139_v62 = vpop.f32.mrf.mxu0  ;;  %1084 = vst [vmem:[%s1307_s10 + $0x58] sm:$0xff] %v1052_v56   ;;  %v1047_v63 = vpack.c.bf16 %v1329_v57, %v1323_v45  ;;  %v1335_v0 = vpop.f32.mrf.mxu1 }
  0xfd   : > { %1075 = vst [vmem:[%s1307_s10 + $0x10] sm:$0xff] %v1007_v59   ;;  %v704_v2 = vadd.f32 %v1135_v39, %v703_v60  ;;  %v773_v3 = vadd.f32 %v772_v58, %v742_v61  ;;  %v747_v26 = vmul.f32 %v1139_v62, %v1139_v62  ;;  %v753_v61 = vmul.f32 %v1300_v27, %v1300_v27 }
  0xfe   : > { %v444_v4 = vpop.f32.mrf.mxu0  ;;  %1083 = vst [vmem:[%s1307_s10 + $0x50] sm:$0xff] %v1047_v63   ;;  %v1339_v5 = vpop.f32.mrf.mxu1 }
  0xff   : > { %v774_v7 = vadd.f32 %v773_v3, %v743_v1  ;;  %v705_v8 = vadd.f32 %v1136_v49, %v704_v2  ;;  %v745_v12 = vmul.f32 %v444_v4, %v444_v4  ;;  %v754_v2 = vmul.f32 %v1313_v34, %v1313_v34 }
 0x100   : > { %v1140_v9 = vpop.f32.mrf.mxu0  ;;  %v1341_v10 = vpop.f32.mrf.mxu1 }
 0x101   : > { %v706_v11 = vadd.f32 %v705_v8, %v444_v4  ;;  %v775_v13 = vadd.f32 %v774_v7, %v744_v6  ;;  %v1022_v14 = vpack.c.bf16 %v1140_v9, %v1139_v62  ;;  %v1062_v16 = vpack.c.bf16 %v1341_v10, %v1335_v0 }
 0x102   : > { %v447_v15 = vpop.f32.mrf.mxu0  ;;  %v1345_v17 = vpop.f32.mrf.mxu1  ;;  %v748_v33 = vmul.f32 %v1140_v9, %v1140_v9  ;;  %v756_v8 = vmul.f32 %v1309_v29, %v1309_v29 }
 0x103   : > { %v776_v18 = vadd.f32 %v775_v13, %v745_v12  ;;  %1078 = vst [vmem:[%s1307_s10 + $0x28] sm:$0xff] %v1022_v14   ;;  %v1017_v19 = vpack.c.bf16 %v447_v15, %v444_v4  ;;  %v707_v20 = vadd.f32 %v706_v11, %v447_v15  ;;  %v746_v21 = vmul.f32 %v447_v15, %v447_v15 }
 0x104   : > { %v1143_v22 = vpop.f32.mrf.mxu0  ;;  %1086 = vst [vmem:[%s1307_s10 + $0x68] sm:$0xff] %v1062_v16   ;;  %v1057_v23 = vpack.c.bf16 %v1345_v17, %v1339_v5  ;;  %v1351_v24 = vpop.f32.mrf.mxu1  ;;  %v755_v4 = vmul.f32 %v1298_v25, %v1298_v25  ;;  %v757_v12 = vmul.f32 %v1323_v45, %v1323_v45  ;;  %v758_v15 = vmul.f32 %v1329_v57, %v1329_v57 }
 0x105   : > { %1077 = vst [vmem:[%s1307_s10 + $0x20] sm:$0xff] %v1017_v19   ;;  %v708_v28 = vadd.f32 %v1139_v62, %v707_v20  ;;  %v777_v30 = vadd.f32 %v776_v18, %v746_v21  ;;  %v751_v54 = vmul.f32 %v1143_v22, %v1143_v22  ;;  %v761_v21 = vmul.f32 %v1339_v5, %v1339_v5 }
 0x106   : > { %v460_v31 = vpop.f32.mrf.mxu0  ;;  %1085 = vst [vmem:[%s1307_s10 + $0x60] sm:$0xff] %v1057_v23   ;;  %v1355_v32 = vpop.f32.mrf.mxu1 }
 0x107   : > { %v778_v35 = vadd.f32 %v777_v30, %v747_v26  ;;  %v709_v36 = vadd.f32 %v1140_v9, %v708_v28  ;;  %v749_v41 = vmul.f32 %v460_v31, %v460_v31  ;;  %v762_v26 = vmul.f32 %v1345_v17, %v1345_v17 }
 0x108   : > { %v1144_v37 = vpop.f32.mrf.mxu0  ;;  %v1357_v38 = vpop.f32.mrf.mxu1 }
 0x109   : > { %v710_v39 = vadd.f32 %v709_v36, %v460_v31  ;;  %v779_v42 = vadd.f32 %v778_v35, %v748_v33  ;;  %v1032_v43 = vpack.c.bf16 %v1144_v37, %v1143_v22  ;;  %v1072_v46 = vpack.c.bf16 %v1357_v38, %v1351_v24 }
 0x10a   : > { %v463_v44 = vpop.f32.mrf.mxu0  ;;  %v527_v47 = vpop.f32.mrf.mxu1  ;;  %v752_v58 = vmul.f32 %v1144_v37, %v1144_v37  ;;  %v765_v35 = vmul.f32 %v1355_v32, %v1355_v32 }
 0x10b   : > { %v780_v48 = vadd.f32 %v779_v42, %v749_v41  ;;  %1080 = vst [vmem:[%s1307_s10 + $0x38] sm:$0xff] %v1032_v43   ;;  %v1027_v49 = vpack.c.bf16 %v463_v44, %v460_v31  ;;  %v711_v51 = vadd.f32 %v710_v39, %v463_v44  ;;  %v750_v52 = vmul.f32 %v463_v44, %v463_v44 }
 0x10c   : > { %1088 = vst [vmem:[%s1307_s10 + $0x78] sm:$0xff] %v1072_v46   ;;  %v1067_v53 = vpack.c.bf16 %v527_v47, %v1355_v32  ;;  %v766_v39 = vmul.f32 %v527_v47, %v527_v47  ;;  %v768_v43 = vmul.f32 %v1357_v38, %v1357_v38 }
 0x10d   : > { %1079 = vst [vmem:[%s1307_s10 + $0x30] sm:$0xff] %v1027_v49   ;;  %v712_v55 = vadd.f32 %v1143_v22, %v711_v51  ;;  %v781_v56 = vadd.f32 %v780_v48, %v750_v52 }
 0x10e   : > { %1087 = vst [vmem:[%s1307_s10 + $0x70] sm:$0xff] %v1067_v53  }
 0x10f   : > { %v713_v59 = vadd.f32 %v1144_v37, %v712_v55  ;;  %v782_v60 = vadd.f32 %v781_v56, %v751_v54 }
 0x111   : > { %v783_v62 = vadd.f32 %v782_v60, %v752_v58  ;;  %v714_v63 = vadd.f32 %v713_v59, %v1300_v27 }
 0x113   : > { %v715_v1 = vadd.f32 %v714_v63, %v1313_v34  ;;  %v784_v3 = vadd.f32 %v783_v62, %v753_v61 }
 0x115   : > { %v716_v6 = vadd.f32 %v1298_v25, %v715_v1  ;;  %v785_v7 = vadd.f32 %v784_v3, %v754_v2  ;;  %v759_v25 = vmul.f32 %v1319_v40, %v1319_v40 }
 0x117   : > { %v786_v9 = vadd.f32 %v785_v7, %v755_v4  ;;  %v717_v11 = vadd.f32 %v1309_v29, %v716_v6  ;;  %v760_v29 = vmul.f32 %v1325_v50, %v1325_v50 }
 0x119   : > { %v718_v27 = vadd.f32 %v717_v11, %v1323_v45  ;;  %v787_v13 = vadd.f32 %v786_v9, %v756_v8 }
 0x11b   : > { %v788_v34 = vadd.f32 %v787_v13, %v757_v12  ;;  %v719_v14 = vadd.f32 %v718_v27, %v1329_v57 }
 0x11d   : > { %v720_v16 = vadd.f32 %v1319_v40, %v719_v14  ;;  %v789_v18 = vadd.f32 %v788_v34, %v758_v15  ;;  %v763_v40 = vmul.f32 %v1335_v0, %v1335_v0 }
 0x11f   : > { %v790_v19 = vadd.f32 %v789_v18, %v759_v25  ;;  %v721_v20 = vadd.f32 %v1325_v50, %v720_v16  ;;  %v764_v50 = vmul.f32 %v1341_v10, %v1341_v10 }
 0x121   : > { %v722_v45 = vadd.f32 %v721_v20, %v1339_v5  ;;  %v791_v22 = vadd.f32 %v790_v19, %v760_v29 }
 0x123   : > { %v792_v23 = vadd.f32 %v791_v22, %v761_v21  ;;  %v723_v57 = vadd.f32 %v722_v45, %v1345_v17 }
 0x125   : > { %v724_v28 = vadd.f32 %v1335_v0, %v723_v57  ;;  %v793_v30 = vadd.f32 %v792_v23, %v762_v26  ;;  %v767_v0 = vmul.f32 %v1351_v24, %v1351_v24 }
 0x127   : > { %v794_v31 = vadd.f32 %v793_v30, %v763_v40  ;;  %v725_v5 = vadd.f32 %v1341_v10, %v724_v28 }
 0x129   : > { %v726_v33 = vadd.f32 %v725_v5, %v1355_v32  ;;  %v795_v17 = vadd.f32 %v794_v31, %v764_v50 }
 0x12b   : > { %v796_v36 = vadd.f32 %v795_v17, %v765_v35  ;;  %v727_v37 = vadd.f32 %v726_v33, %v527_v47 }
 0x12d   : > { %v728_v41 = vadd.f32 %v1351_v24, %v727_v37  ;;  %v797_v42 = vadd.f32 %v796_v36, %v766_v39 }
 0x12f   : > { %v729_v10 = vadd.f32 %v1357_v38, %v728_v41  ;;  %v798_v44 = vadd.f32 %v797_v42, %v767_v0 }
 0x131   : > { %v730_v46 = vrot.slane %v729_v10, 4  ;;  %v799_v48 = vadd.f32 %v798_v44, %v768_v43 }
 0x133   : > { %v731_v32 = vadd.f32 %v730_v46, %v729_v10  ;;  %v800_v49 = vrot.slane %v799_v48, 4 }
 0x135   : > { %v732_v51 = vrot.slane %v731_v32, 2  ;;  %v801_v47 = vadd.f32 %v800_v49, %v799_v48 }
 0x137   : > { %v733_v52 = vadd.f32 %v732_v51, %v731_v32  ;;  %v802_v53 = vrot.slane %v801_v47, 2 }
 0x139   : > { %v734_v54 = vrot.slane %v733_v52, 1  ;;  %v803_v24 = vadd.f32 %v802_v53, %v801_v47 }
 0x13b   : > { %v735_v55 = vadd.f32 %v734_v54, %v733_v52  ;;  %v804_v56 = vrot.slane %v803_v24, 1 }
 0x13d   : > { %736 = vst [vmem:[%s184_s16] sm:$0x1] %v735_v55  ;;  %v805_v38 = vadd.f32 %v804_v56, %v803_v24 }
 0x13f   : > { %806 = vst [vmem:[%s184_s16 + $0x1] sm:$0x1] %v805_v38 }
 0x140 PF: > { %s14_s12 = sadd.s32 1, %s1215_s12  }
 0x141   : > { %p11_p5 = scmp.ge.s32.totalorder %s14_s12, 4  }
 0x143   :  { %13 = sbr.rel (!%p11_p5) target bundleno = 1 (0x1), region = 70 }

</bundles_post_ra>
